<compile_context>
chip_gen: v6e
topology: v6e:2x2x1
jax: 0.10.0
libtpu: 0.0.40
codegen_flags: <defaults>
</compile_context>

<pallas_src>
import functools
import math

import jax
import jax.numpy as jnp
from jax import lax
from jax.experimental import pallas as pl
from jax.experimental.pallas import tpu as pltpu


# ----------------------- generation-aware VMEM budget ------------------------


def _physical_vmem_bytes():
    """Physical VMEM per TensorCore; conservative 64 MiB (v7x) fallback."""
    try:
        info_fn = getattr(pltpu, "get_tpu_info", None)
        if info_fn is not None:
            info = info_fn()
            for name in ("vmem_capacity_bytes", "vmem_bytes", "vmem_size_bytes"):
                cap = getattr(info, name, None)
                if cap:
                    return int(cap)
    except Exception:
        pass
    return 64 * 1024 * 1024


_PHYS_VMEM = _physical_vmem_bytes()
# Ask for 3/4 of physical (96 MiB on v5e/v6e's 128 MiB, 48 MiB on v7x's 64 MiB),
# leaving headroom for Mosaic internal scratch.
_VMEM_LIMIT = min((_PHYS_VMEM * 3) // 4, 96 * 1024 * 1024)


# ------------------------------ tile helpers --------------------------------


def _pick_tile(dim, target, align):
    """Largest tile t dividing `dim` with t == dim or t % align == 0, t <= target."""
    if dim <= target:
        return dim
    t = (target // align) * align
    while t >= align:
        if dim % t == 0:
            return t
        t -= align
    return dim  # no aligned divisor found; fall back to the full dimension


def _largest_divisor_at_most(n, cap):
    cap = max(1, min(n, cap))
    for g in range(cap, 0, -1):
        if n % g == 0:
            return g
    return 1


def _attention_plan(bh, l, s, d, vmem_limit):
    """Pick (G heads/step, tL, tS) so the real per-step footprint fits VMEM."""
    itemsize = 4
    ts_target = 1024 if vmem_limit >= (48 << 20) else 512
    t_s = _pick_tile(s, ts_target, 128)
    t_l = _pick_tile(l, 256, 8)

    def footprint(g):
        q = g * t_l * d
        kv = 2 * g * t_s * d
        o = g * t_l * d
        msk = t_l * t_s
        pipelined = 2 * (q + kv + o + msk)       # double-buffered blocks
        scratch = g * t_l * (2 + d)              # m_sc, l_sc, acc_sc
        logits = 2 * g * t_l * t_s               # s and p live intermediates
        return (pipelined + scratch + logits) * itemsize

    budget = int(vmem_limit * 0.6)
    cap = bh
    while cap > 1 and footprint(cap) > budget:
        cap -= 1
    g = _largest_divisor_at_most(bh, cap)
    return g, t_l, t_s


# ------------------ tiled linear: x @ W.T + b (PyTorch layout) ---------------


def _linear_kernel(x_ref, w_ref, b_ref, o_ref, acc_ref):
    # blocks: x (tm, tk), w (tn, tk) in PyTorch (out,in) layout, b (1, tn),
    # o (tm, tn).  Contract on the weight's second axis so the wrapper never
    # materializes a transposed weight copy in HBM.
    @pl.when(pl.program_id(2) == 0)
    def _init():
        acc_ref[...] = jnp.zeros_like(acc_ref)

    acc_ref[...] += lax.dot_general(
        x_ref[...], w_ref[...],
        dimension_numbers=(((1,), (1,)), ((), ())),
        preferred_element_type=jnp.float32)

    @pl.when(pl.program_id(2) == pl.num_programs(2) - 1)
    def _finalize():
        o_ref[...] = (acc_ref[...] + b_ref[...]).astype(o_ref.dtype)


def pallas_linear(x, w, b):
    """x: (M, K) @ w.T with w: (F, K) (PyTorch layout) + b: (F,) -> (M, F)."""
    M, K = x.shape
    F = w.shape[0]
    tm = _pick_tile(M, 512, 8)
    tn = _pick_tile(F, 512, 128)
    tk = _pick_tile(K, 512, 128)
    grid = (M // tm, F // tn, K // tk)
    return pl.pallas_call(
        _linear_kernel,
        out_shape=jax.ShapeDtypeStruct((M, F), x.dtype),
        grid=grid,
        in_specs=[
            pl.BlockSpec((tm, tk), lambda i, j, k: (i, k)),
            pl.BlockSpec((tn, tk), lambda i, j, k: (j, k)),
            pl.BlockSpec((1, tn), lambda i, j, k: (0, j)),
        ],
        out_specs=pl.BlockSpec((tm, tn), lambda i, j, k: (i, j)),
        scratch_shapes=[pltpu.VMEM((tm, tn), jnp.float32)],
        compiler_params=pltpu.CompilerParams(
            dimension_semantics=("parallel", "parallel", "arbitrary"),
            vmem_limit_bytes=_VMEM_LIMIT,
        ),
    )(x, w, b.reshape(1, F))


# ------------- flash attention: G heads/step, L-tiled, S-tiled ---------------


def _flash_attn_kernel(q_ref, k_ref, v_ref, mask_ref, o_ref,
                       m_sc, l_sc, acc_sc, *, scale):
    # q: (G, tL, D), k/v: (G, tS, D), mask: (tL, tS), o: (G, tL, D)
    s_idx = pl.program_id(2)

    @pl.when(s_idx == 0)
    def _init():
        m_sc[...] = jnp.full(m_sc.shape, -jnp.inf, jnp.float32)
        l_sc[...] = jnp.zeros(l_sc.shape, jnp.float32)
        acc_sc[...] = jnp.zeros(acc_sc.shape, jnp.float32)

    q = q_ref[...]
    k = k_ref[...]
    v = v_ref[...]

    s = jnp.einsum("gld,gsd->gls", q, k,
                   preferred_element_type=jnp.float32) * scale
    s = s + mask_ref[...][None, :, :]

    m_prev = m_sc[...]
    m_new = jnp.maximum(m_prev, jnp.max(s, axis=-1, keepdims=True))
    alpha = jnp.exp(m_prev - m_new)
    # TODO(synk): on v6e/v7x, p could be computed in bf16 (EUP bf16 rate, half
    # the PV-matmul bytes); kept f32 so numerics match the torch reference.
    p = jnp.exp(s - m_new)

    l_sc[...] = alpha * l_sc[...] + jnp.sum(p, axis=-1, keepdims=True)
    acc_sc[...] = alpha * acc_sc[...] + jnp.einsum(
        "gls,gsd->gld", p.astype(v.dtype), v,
        preferred_element_type=jnp.float32)
    m_sc[...] = m_new

    @pl.when(s_idx == pl.num_programs(2) - 1)
    def _finalize():
        # Exact reciprocal: applied only once per (G, tL, D) output block at
        # finalize, so it costs ~nothing and stays bit-close to torch softmax.
        inv_l = pl.reciprocal(l_sc[...], approx=False)
        o_ref[...] = (acc_sc[...] * inv_l).astype(o_ref.dtype)


def pallas_flash_attention(q, k, v, mask):
    """q: (BH, L, D), k/v: (BH, S, D), mask: (L, S) additive -> (BH, L, D)."""
    BH, L, D = q.shape
    S = k.shape[1]
    G, tL, tS = _attention_plan(BH, L, S, D, _VMEM_LIMIT)
    kernel = functools.partial(_flash_attn_kernel, scale=1.0 / math.sqrt(D))
    grid = (BH // G, L // tL, S // tS)
    # TODO(synk): on v5e, pipeline_mode=pl.Buffered(3) on the k/v specs could
    # hide the K/V stream DMA when D is small; left at default depth 2 for
    # lowering robustness across jax versions.
    return pl.pallas_call(
        kernel,
        out_shape=jax.ShapeDtypeStruct((BH, L, D), q.dtype),
        grid=grid,
        in_specs=[
            pl.BlockSpec((G, tL, D), lambda g, l, s: (g, l, 0)),
            pl.BlockSpec((G, tS, D), lambda g, l, s: (g, s, 0)),
            pl.BlockSpec((G, tS, D), lambda g, l, s: (g, s, 0)),
            pl.BlockSpec((tL, tS), lambda g, l, s: (l, s)),
        ],
        out_specs=pl.BlockSpec((G, tL, D), lambda g, l, s: (g, l, 0)),
        scratch_shapes=[
            pltpu.VMEM((G, tL, 1), jnp.float32),   # running max
            pltpu.VMEM((G, tL, 1), jnp.float32),   # running denom
            pltpu.VMEM((G, tL, D), jnp.float32),   # output accumulator
        ],
        compiler_params=pltpu.CompilerParams(
            dimension_semantics=("parallel", "parallel", "arbitrary"),
            vmem_limit_bytes=_VMEM_LIMIT,
        ),
    )(q, k, v, mask)


# --------------------------- module-level wrapper ---------------------------


def init_params(key, embed_size):
    """Deterministic init matching nn.MultiheadAttention parameter shapes."""
    k1, k2 = jax.random.split(key, 2)
    bound = 1.0 / math.sqrt(embed_size)
    return {
        "in_proj_weight": jax.random.uniform(
            k1, (3 * embed_size, embed_size), minval=-bound, maxval=bound,
            dtype=jnp.float32),
        "in_proj_bias": jnp.zeros((3 * embed_size,), jnp.float32),
        "out_proj_weight": jax.random.uniform(
            k2, (embed_size, embed_size), minval=-bound, maxval=bound,
            dtype=jnp.float32),
        "out_proj_bias": jnp.zeros((embed_size,), jnp.float32),
    }


def group_query_attention(params, query, key, value, mask, num_heads):
    L, N, E = query.shape
    S = key.shape[0]
    H = num_heads
    D = E // H

    W = params["in_proj_weight"]   # (3E, E), PyTorch (out, in) layout
    b = params["in_proj_bias"]     # (3E,)

    q2d = query.reshape(L * N, E)
    if (query is key) and (key is value):
        # True self-attention: one fused QKV matmul, sliced afterwards — no
        # activation stacking, no weight transpose copies.
        qkv = pallas_linear(q2d, W, b)                       # (L*N, 3E)
        q, k, v = qkv[:, :E], qkv[:, E:2 * E], qkv[:, 2 * E:]
    else:
        q = pallas_linear(q2d, W[:E], b[:E])
        if key is value:
            kv = pallas_linear(key.reshape(S * N, E), W[E:], b[E:])
            k, v = kv[:, :E], kv[:, E:]
        else:
            k = pallas_linear(key.reshape(S * N, E), W[E:2 * E], b[E:2 * E])
            v = pallas_linear(value.reshape(S * N, E), W[2 * E:], b[2 * E:])

    # (L, N*H, D) -> (N*H, L, D)   (same head split as PyTorch)
    # TODO(synk): folding these layout transposes into the attention BlockSpecs
    # needs a non-leading-batch dot_general / in-kernel sublane relayout; kept
    # as XLA ops for Mosaic-lowering robustness at small D.
    q = q.reshape(L, N * H, D).transpose(1, 0, 2)
    k = k.reshape(S, N * H, D).transpose(1, 0, 2)
    v = v.reshape(S, N * H, D).transpose(1, 0, 2)

    attn = pallas_flash_attention(q, k, v, mask)      # (N*H, L, D)
    attn = attn.transpose(1, 0, 2).reshape(L * N, E)

    out = pallas_linear(attn, params["out_proj_weight"], params["out_proj_bias"])
    return out.reshape(L, N, E)


# ------------------------------ pure-JAX ref --------------------------------


def reference_mha(params, query, key, value, mask, num_heads):
    L, N, E = query.shape
    S = key.shape[0]
    H = num_heads
    D = E // H
    W = params["in_proj_weight"]
    b = params["in_proj_bias"]
    q = query.reshape(L * N, E) @ W[:E].T + b[:E]
    k = key.reshape(S * N, E) @ W[E:2 * E].T + b[E:2 * E]
    v = value.reshape(S * N, E) @ W[2 * E:].T + b[2 * E:]
    q = q.reshape(L, N * H, D).transpose(1, 0, 2)
    k = k.reshape(S, N * H, D).transpose(1, 0, 2)
    v = v.reshape(S, N * H, D).transpose(1, 0, 2)
    s = jnp.einsum("bld,bsd->bls", q, k) / math.sqrt(D) + mask[None]
    p = jax.nn.softmax(s, axis=-1)
    o = jnp.einsum("bls,bsd->bld", p, v)
    o = o.transpose(1, 0, 2).reshape(L * N, E)
    o = o @ params["out_proj_weight"].T + params["out_proj_bias"]
    return o.reshape(L, N, E)


# ---------------------------------- main ------------------------------------

if __name__ == "__main__":
    embed_size = 32
    num_heads = 4
    L = S = 8     # target / source sequence length
    N = 2         # batch

    root = jax.random.PRNGKey(0)
    kp, kq, kk, kv = jax.random.split(root, 4)

    params = init_params(kp, embed_size)
    query = jax.random.normal(kq, (L, N, embed_size), dtype=jnp.float32)
    key = jax.random.normal(kk, (S, N, embed_size), dtype=jnp.float32)
    value = jax.random.normal(kv, (S, N, embed_size), dtype=jnp.float32)

    # Additive float attention mask (causal): 0 where allowed, -1e9 where blocked.
    row = jnp.arange(L)[:, None]
    col = jnp.arange(S)[None, :]
    mask = jnp.where(col <= row, 0.0, -1e9).astype(jnp.float32)

    out = group_query_attention(params, query, key, value, mask, num_heads)
    out = jax.block_until_ready(out)

    ref = reference_mha(params, query, key, value, mask, num_heads)
    assert out.shape == (L, N, embed_size)
    assert jnp.allclose(out, ref, atol=1e-4, rtol=1e-4), "mismatch vs reference"

    print("KERNEL_OK")
</pallas_src>

<mosaic_0001>
module attributes {stable_mosaic.version = 11 : i64} {
  func.func @_linear_kernel(%arg0: i32, %arg1: i32, %arg2: i32, %arg3: memref<16x32xf32, #tpu.memory_space<vmem>>, %arg4: memref<32x32xf32, #tpu.memory_space<vmem>>, %arg5: memref<1x32xf32, #tpu.memory_space<vmem>>, %arg6: memref<16x32xf32, #tpu.memory_space<vmem>>, %arg7: memref<16x32xf32, #tpu.memory_space<vmem>>) attributes {dimension_semantics = [#tpu.dimension_semantics<parallel>, #tpu.dimension_semantics<parallel>, #tpu.dimension_semantics<arbitrary>], iteration_bounds = array<i64: 1, 1, 1>, scalar_prefetch = 0 : i64, scratch_operands = 1 : i64, tpu.core_type = #tpu.core_type<tc>, window_params = [{transform_indices = @transform_0, window_bounds = array<i64: 16, 32>}, {transform_indices = @transform_1, window_bounds = array<i64: 32, 32>}, {transform_indices = @transform_2, window_bounds = array<i64: 1, 32>}, {transform_indices = @transform_3, window_bounds = array<i64: 16, 32>}]} {
    %c0_i32 = arith.constant 0 : i32
    %0 = arith.cmpi eq, %arg2, %c0_i32 : i32
    %1 = arith.extui %0 : i1 to i32
    %c0_i32_0 = arith.constant 0 : i32
    %2 = arith.cmpi ne, %1, %c0_i32_0 : i32
    scf.if %2 {
      %cst_10 = arith.constant 0.000000e+00 : f32
      %12 = vector.broadcast %cst_10 : f32 to vector<16x32xf32>
      %c0_11 = arith.constant 0 : index
      %c0_12 = arith.constant 0 : index
      %13 = vector.load %arg7[%c0_11, %c0_12] : memref<16x32xf32, #tpu.memory_space<vmem>>, vector<16x32xf32>
      tpu.vector_store %arg7[%c0_11, %c0_12], %12 {strides = array<i32>} : memref<16x32xf32, #tpu.memory_space<vmem>>, vector<16x32xf32>,
    } else {
    }
    %c0 = arith.constant 0 : index
    %c0_1 = arith.constant 0 : index
    %3 = vector.load %arg7[%c0, %c0_1] : memref<16x32xf32, #tpu.memory_space<vmem>>, vector<16x32xf32>
    %c0_2 = arith.constant 0 : index
    %c0_3 = arith.constant 0 : index
    %4 = vector.load %arg3[%c0_2, %c0_3] : memref<16x32xf32, #tpu.memory_space<vmem>>, vector<16x32xf32>
    %c0_4 = arith.constant 0 : index
    %c0_5 = arith.constant 0 : index
    %5 = vector.load %arg4[%c0_4, %c0_5] : memref<32x32xf32, #tpu.memory_space<vmem>>, vector<32x32xf32>
    %cst = arith.constant dense<0.000000e+00> : vector<16x32xf32>
    %6 = tpu.matmul %4, %5, %cst {dimension_numbers = #tpu.dot_dimension_numbers<[1], [1], [0], [0], [0, 0, 1, 0], [], []>} : vector<16x32xf32>, vector<32x32xf32>, vector<16x32xf32> -> vector<16x32xf32>
    %7 = arith.addf %3, %6 : vector<16x32xf32>
    %c0_6 = arith.constant 0 : index
    %c0_7 = arith.constant 0 : index
    %8 = vector.load %arg7[%c0_6, %c0_7] : memref<16x32xf32, #tpu.memory_space<vmem>>, vector<16x32xf32>
    tpu.vector_store %arg7[%c0_6, %c0_7], %7 {strides = array<i32>} : memref<16x32xf32, #tpu.memory_space<vmem>>, vector<16x32xf32>,
    %c0_i32_8 = arith.constant 0 : i32
    %9 = arith.cmpi eq, %arg2, %c0_i32_8 : i32
    %10 = arith.extui %9 : i1 to i32
    %c0_i32_9 = arith.constant 0 : i32
    %11 = arith.cmpi ne, %10, %c0_i32_9 : i32
    scf.if %11 {
      %c0_10 = arith.constant 0 : index
      %c0_11 = arith.constant 0 : index
      %12 = vector.load %arg7[%c0_10, %c0_11] : memref<16x32xf32, #tpu.memory_space<vmem>>, vector<16x32xf32>
      %c0_12 = arith.constant 0 : index
      %c0_13 = arith.constant 0 : index
      %13 = vector.load %arg5[%c0_12, %c0_13] : memref<1x32xf32, #tpu.memory_space<vmem>>, vector<1x32xf32>
      %14 = vector.broadcast %13 : vector<1x32xf32> to vector<16x32xf32>
      %15 = arith.addf %12, %14 : vector<16x32xf32>
      %c0_14 = arith.constant 0 : index
      %c0_15 = arith.constant 0 : index
      %16 = vector.load %arg6[%c0_14, %c0_15] : memref<16x32xf32, #tpu.memory_space<vmem>>, vector<16x32xf32>
      tpu.vector_store %arg6[%c0_14, %c0_15], %15 {strides = array<i32>} : memref<16x32xf32, #tpu.memory_space<vmem>>, vector<16x32xf32>,
    } else {
    }
    return
  }
  func.func @transform_0(%arg0: i32, %arg1: i32, %arg2: i32) -> (i32, i32) {
    %c0_i32 = arith.constant 0 : i32
    return %arg0, %arg2 : i32, i32
  }
  func.func @transform_1(%arg0: i32, %arg1: i32, %arg2: i32) -> (i32, i32) {
    %c0_i32 = arith.constant 0 : i32
    return %arg1, %arg2 : i32, i32
  }
  func.func @transform_2(%arg0: i32, %arg1: i32, %arg2: i32) -> (i32, i32) {
    %c0_i32 = arith.constant 0 : i32
    %c0_i32_0 = arith.constant 0 : i32
    return %c0_i32, %arg1 : i32, i32
  }
  func.func @transform_3(%arg0: i32, %arg1: i32, %arg2: i32) -> (i32, i32) {
    %c0_i32 = arith.constant 0 : i32
    return %arg0, %arg1 : i32, i32
  }
}

</mosaic_0001>

<bundles_post_ra>
// kernel: tpu_custom_call.1
= control target key start
LH: loop header
LB: loop body
LE: loop exit
PB: predicated region body
PF: predicated region fallthrough
CT: control target
= control target key end

     0   :  { %8 = vsyncpa [#allocation4], 0  ;;  %s349_s0 = inlined_call_operand.hbm [shape: f32[16,32], index: 0, kind: input, shape index: {}]   ;;  %s350_s1 = inlined_call_operand.hbm [shape: f32[32,32], index: 1, kind: input, shape index: {}]   ;;  %s351_s2 = inlined_call_operand.vmem [shape: f32[1,32], index: 2, kind: input, shape index: {}]   ;;  %s352_s3 = inlined_call_operand.hbm [shape: f32[16,32], index: 3, kind: output, shape index: {}]  }
   0x1   :  { %9 = vsyncpa [#allocation7], 0 }
   0x2   :  { %10 = vsyncpa [#allocation5], 0  ;;  %s286_s12 = smov [#allocation3]  }
   0x3   :  { %s16_s13 = sshll.u32 %s286_s12, 4  ;;  %s17_s13 = int_to_ptr.vmem [resolvable:$true] %s16_s13 }
   0x4   :  { %s228_s14 = scalar_lea.vmem %s17_s13, 256  ;;  %p233_p1 = scmp.lt.s32.totalorder %s17_s13, %s17_s13 }
   0x5   :  { %p229_p0 = scmp.ne.s32.totalorder %s17_s13, %s228_s14  ;;  %p234_p2 = scmp.lt.s32.totalorder %s228_s14, %s228_s14 }
   0x7   :  { %p235_p3 = por %p234_p2, %p233_p1 }
   0x9   :  { %p236_p4 = pnand %p235_p3, %p229_p0 }
   0xb   :  { %239 = shalt.err (!%p236_p4)
}
   0xc   :  { %s287_s15 = smov 128   ;;  %s288_s16 = smov 8  }
   0xd   :  { %22 = dma.hbm_to_vmem [thread:$0]  %s349_s0, 256, %s17_s13, [#allocation4], %s287_s15, %s287_s15, %s288_s16  }
   0xe   :  { %s289_s19 = smov [#allocation6]  }
   0xf   :  { %s28_s20 = sshll.u32 %s289_s19, 4  ;;  %s29_s20 = int_to_ptr.vmem [resolvable:$true] %s28_s20 }
  0x10   :  { %s248_s21 = scalar_lea.vmem %s29_s20, 512  ;;  %p253_p6 = scmp.lt.s32.totalorder %s29_s20, %s29_s20 }
  0x11   :  { %p249_p5 = scmp.ne.s32.totalorder %s29_s20, %s248_s21  ;;  %p254_p7 = scmp.lt.s32.totalorder %s248_s21, %s248_s21 }
  0x13   :  { %p255_p8 = por %p254_p7, %p253_p6 }
  0x15   :  { %p256_p9 = pnand %p255_p8, %p249_p5 }
  0x17   :  { %259 = shalt.err (!%p256_p9)
}
  0x18   :  { %34 = dma.hbm_to_vmem [thread:$0]  %s350_s1, 512, %s29_s20, [#allocation7], %s287_s15, %s287_s15, %s288_s16  }
  0x19   :  { %280 = dma.done.wait [#allocation4], 256  }
  0x1a   :  { %281 = vsyncadd [#allocation4], 4294967040 }
  0x1b   :  { %282 = dma.done.wait [#allocation7], 512  }
  0x1c   :  { %283 = vsyncadd [#allocation7], 4294966784  ;;  %vm47_vm0 = vcmask 261120   ;;  %v290_v0 = vmov 0.0   ;;  %v57_v1 = vld [vmem:[#allocation6 + $0x18] sm:$0xff]  ;;  %v56_v2 = vld [vmem:[#allocation6 + $0x10] sm:$0xff] }
  0x1d   :  { %49 = vst.msk [vmem:[#allocation2 + $0x8] sm:$0xff] %vm47_vm0, %v290_v0  ;;  %48 = vst.msk [vmem:[#allocation2] sm:$0xff] %vm47_vm0, %v290_v0  ;;  %203 = vmatprep.subr.msk.mxu0 %vm47_vm0, %v57_v1  ;;  %v52_v3 = vld [vmem:[#allocation3] sm:$0xff]  ;;  %v55_v4 = vld [vmem:[#allocation6 + $0x8] sm:$0xff]  ;;  %s291_s24 = smov [#allocation8]  }
  0x1e   :  { %204 = vmatpush3.xpose.msk.msra.mxu0 %vm47_vm0, %v57_v1  ;;  %211 = vmatprep.mubr.msk.f32.mxu0 %vm47_vm0, %v52_v3  ;;  %v54_v5 = vld [vmem:[#allocation6] sm:$0xff]  ;;  %v53_v6 = vld [vmem:[#allocation3 + $0x8] sm:$0xff]  ;;  %s177_s25 = sshll.u32 %s291_s24, 4  ;;  %s178_s25 = int_to_ptr.vmem [resolvable:$true] %s177_s25 }
  0x1f   :  { %205 = vmatprep.subr.msk.mxu0 %vm47_vm0, %v56_v2  ;;  %v196_v13 = vld [vmem:[%s351_s2] ss:$0 sm:$0xff]  ;;  %s260_s26 = scalar_lea.vmem %s178_s25, 256  ;;  %p265_p11 = scmp.lt.s32.totalorder %s178_s25, %s178_s25 }
  0x20   :  { %p261_p10 = scmp.ne.s32.totalorder %s178_s25, %s260_s26  ;;  %p266_p12 = scmp.lt.s32.totalorder %s260_s26, %s260_s26 }
  0x22   :  { %206 = vmatpush3.xpose.msk.msra.mxu0 %vm47_vm0, %v56_v2  ;;  %p267_p13 = por %p266_p12, %p265_p11 }
  0x23   :  { %207 = vmatprep.subr.msk.mxu0 %vm47_vm0, %v55_v4 }
  0x24   :  { %v51_v7 = vld [vmem:[#allocation2 + $0x8] sm:$0xff]  ;;  %v50_v9 = vld [vmem:[#allocation2] sm:$0xff]  ;;  %p268_p0 = pnand %p267_p13, %p261_p10 }
  0x26   :  { %208 = vmatpush3.xpose.msk.msra.mxu0 %vm47_vm0, %v55_v4 }
  0x27   :  { %209 = vmatprep.subr.msk.mxu0 %vm47_vm0, %v54_v5 }
  0x2a   :  { %210 = vmatpush3.xpose.msk.msra.mxu0 %vm47_vm0, %v54_v5 }
  0x2d   :  { %212 = vmatmul.mubr.msk.f32.vlgmr.msra.gmra.mxu0 %vm47_vm0, %v53_v6 }
  0xed   :  { %v213_v8 = vpop.f32.mrf.mxu0 }
  0xee   :  { %v153_v10 = vadd.f32 %v213_v8, %v51_v7 }
  0xef   :  { %v143_v11 = vpop.f32.mrf.mxu0 }
  0xf0   :  { %155 = vst.msk [vmem:[#allocation2 + $0x8] sm:$0xff] %vm47_vm0, %v153_v10  ;;  %v152_v12 = vadd.f32 %v143_v11, %v50_v9 }
  0xf2   :  { %154 = vst.msk [vmem:[#allocation2] sm:$0xff] %vm47_vm0, %v152_v12 }
  0xf7   :  { %v160_v14 = vld [vmem:[#allocation2 + $0x8] sm:$0xff] }
  0xf8   :  { %v169_v15 = vadd.f32 %v196_v13, %v160_v14 }
  0xf9   :  { %v159_v16 = vld [vmem:[#allocation2] sm:$0xff] }
  0xfa   :  { %v168_v17 = vadd.f32 %v196_v13, %v159_v16  ;;  %171 = vst.msk [vmem:[#allocation8 + $0x8] sm:$0xff] %vm47_vm0, %v169_v15 }
  0xfc   :  { %170 = vst.msk [vmem:[#allocation8] sm:$0xff] %vm47_vm0, %v168_v17 }
  0xfd   :  { %271 = shalt.err (!%p268_p0)
}
  0xfe   :  { %183 = dma.vmem_to_hbm [thread:$0]  %s178_s25, 256, %s352_s3, [#allocation5], %s287_s15, %s287_s15, %s288_s16  }
  0xff   :  { %284 = dma.done.wait [#allocation5], 256  }
 0x100   :  { %285 = vsyncadd [#allocation5], 4294967040 }
 0x101   :  { %187 = vsyncpa [#allocation4], 1 }
 0x102   :  { %188 = vsyncpa [#allocation7], 1 }
 0x103   :  { %189 = vsyncpa [#allocation5], 1 }

</bundles_post_ra>
